<compile_context>
chip_gen: v5e
topology: v5e:2x2
jax: 0.10.0
libtpu: 0.0.40
codegen_flags: <defaults>
</compile_context>

<pallas_src>
import functools

import jax
import jax.numpy as jnp
from jax.experimental import pallas as pl
from jax.experimental.pallas import tpu as pltpu

_COMPUTE_DTYPE = jnp.bfloat16  # MXU operand dtype (accumulation stays f32)


def _round_up(x, m):
    return (x + m - 1) // m * m


def _cdiv(a, b):
    return -(-a // b)


def _classifier_kernel(x_ref, w1_ref, b1_ref, w2_ref, b2_ref,
                       w3_ref, b3_ref, w4_ref, b4_ref, out_ref):
    # Entire MLP hot path fused in one kernel invocation per batch tile.
    # Matmul operands are bf16 (MXU-native), accumulation + elementwise in f32.
    x = x_ref[...].astype(_COMPUTE_DTYPE)            # (bt, input_size)

    # ---- encoder ----
    h1 = jnp.dot(x, w1_ref[...], preferred_element_type=jnp.float32) + b1_ref[...]
    h1 = jnp.maximum(h1, 0.0)                        # ReLU (f32)
    # x_e lives in lanes [0, num_features) of the fused output; padded lanes
    # are exact zeros because w2/b2 columns beyond num_features are zero.
    x_e = jnp.dot(h1.astype(_COMPUTE_DTYPE), w2_ref[...],
                  preferred_element_type=jnp.float32) + b2_ref[...]

    # ---- classifier ----
    # w3 rows beyond num_features are zero, so the padded lanes of x_e do not
    # contribute to this contraction.
    h2 = jnp.dot(x_e.astype(_COMPUTE_DTYPE), w3_ref[...],
                 preferred_element_type=jnp.float32) + b3_ref[...]
    h2 = jnp.maximum(h2, 0.0)                        # ReLU (f32)  (== self.hidden)
    # y_logit lives in lanes [num_features, num_features+num_classes); all
    # other lanes are exact zeros (w4/b4 columns outside that range are zero).
    y_logit = jnp.dot(h2.astype(_COMPUTE_DTYPE), w4_ref[...],
                      preferred_element_type=jnp.float32) + b4_ref[...]

    # Non-overlapping lane ranges -> a single lane-dense fused store.
    out_ref[...] = (x_e + y_logit).astype(out_ref.dtype)


def prepare_params(params, *, compute_dtype=_COMPUTE_DTYPE):
    """One-time padding/casting of parameters (hoisted out of the hot path).

    Weights are stored (in, out). w2/b2 are scattered into output lanes
    [0, num_features); w4/b4 into lanes [num_features, num_features+num_classes);
    w3 rows are zero-padded to the fused lane width. All padding is exact zeros
    so the fused output decomposes exactly into (x_e, y_logit).
    """
    w1, b1, w2, b2, w3, b3, w4, b4 = params
    hidden1 = w1.shape[1]            # 256
    num_features = w2.shape[1]
    hidden2 = w3.shape[1]            # 32
    num_classes = w4.shape[1]
    nout = max(128, _round_up(num_features + num_classes, 128))

    f32, cdt = jnp.float32, compute_dtype
    nf, nc = num_features, num_classes

    w1c = w1.astype(cdt)
    b1c = b1.reshape(1, -1).astype(f32)
    w2f = jnp.zeros((hidden1, nout), cdt).at[:, :nf].set(w2.astype(cdt))
    b2f = jnp.zeros((1, nout), f32).at[:, :nf].set(b2.reshape(1, -1).astype(f32))
    w3p = jnp.zeros((nout, hidden2), cdt).at[:nf, :].set(w3.astype(cdt))
    b3c = b3.reshape(1, -1).astype(f32)
    w4f = jnp.zeros((hidden2, nout), cdt).at[:, nf:nf + nc].set(w4.astype(cdt))
    b4f = jnp.zeros((1, nout), f32).at[:, nf:nf + nc].set(b4.reshape(1, -1).astype(f32))
    return (w1c, b1c, w2f, b2f, w3p, b3c, w4f, b4f)


def classifier_forward(x, prepared, *, num_features, num_classes,
                       batch_tile=512, output_dtype=jnp.float32):
    """x: (..., input_size) -> (x_e, y_logit), mirroring Classifier.forward.

    `prepared` comes from prepare_params(). Set output_dtype=jnp.bfloat16 to
    halve output HBM bytes (deviates from the f32 PyTorch contract).
    """
    w1c, b1c, w2f, b2f, w3p, b3c, w4f, b4f = prepared
    input_size = w1c.shape[0]
    nout = w2f.shape[1]

    x2d = x.reshape(-1, input_size)                  # x.view(-1, input_size)
    B = x2d.shape[0]

    # --- balanced batch tiles; no wrapper-side padding (ragged last block) ---
    bt = _round_up(_cdiv(B, max(1, _cdiv(B, batch_tile))), 8)
    if B > 8:
        # >= 2 grid steps so the "parallel" axis shards across both v7x TCs.
        bt = min(bt, _round_up(_cdiv(B, 2), 8))
    bt = max(8, min(bt, _round_up(B, 8)))
    grid = (_cdiv(B, bt),)

    x_map = lambda i: (i, 0)
    rep = lambda a: pl.BlockSpec(a.shape, lambda i: (0, 0))  # resident operand

    fused = pl.pallas_call(
        _classifier_kernel,
        out_shape=jax.ShapeDtypeStruct((B, nout), output_dtype),
        grid_spec=pltpu.PrefetchScalarGridSpec(
            num_scalar_prefetch=0,
            grid=grid,
            in_specs=[
                pl.BlockSpec((bt, input_size), x_map),   # full-extent last dim
                rep(w1c), rep(b1c),
                rep(w2f), rep(b2f),
                rep(w3p), rep(b3c),
                rep(w4f), rep(b4f),
            ],
            out_specs=pl.BlockSpec((bt, nout), x_map),
        ),
        compiler_params=pltpu.CompilerParams(
            dimension_semantics=("parallel",)),
    )(x2d, w1c, b1c, w2f, b2f, w3p, b3c, w4f, b4f)

    x_e = fused[:, :num_features]
    y_logit = fused[:, num_features:num_features + num_classes]
    return x_e, y_logit


def init_params(key, input_size, num_features, num_classes):
    """Deterministic synthetic parameters.

    Weights use xavier_uniform_ (as in the module's __init__); biases use the
    PyTorch Linear default U(-1/sqrt(fan_in), 1/sqrt(fan_in)). Weights are
    stored as (in, out), i.e. transposed w.r.t. PyTorch's (out, in).
    """
    dims = [(input_size, 256), (256, num_features),
            (num_features, 32), (32, num_classes)]
    keys = jax.random.split(key, 2 * len(dims))
    params = []
    for idx, (fan_in, fan_out) in enumerate(dims):
        wk, bk = keys[2 * idx], keys[2 * idx + 1]
        bound_w = (6.0 / (fan_in + fan_out)) ** 0.5        # xavier uniform
        w = jax.random.uniform(wk, (fan_in, fan_out), jnp.float32,
                               minval=-bound_w, maxval=bound_w)
        bound_b = 1.0 / (fan_in ** 0.5)
        b = jax.random.uniform(bk, (1, fan_out), jnp.float32,
                               minval=-bound_b, maxval=bound_b)
        params += [w, b]
    return tuple(params)


def reference_forward(x, params):
    """Reference with the same bf16 operand casts / f32 accumulation as kernel."""
    w1, b1, w2, b2, w3, b3, w4, b4 = params
    cdt = _COMPUTE_DTYPE
    x2d = x.reshape(-1, w1.shape[0]).astype(cdt)
    h1 = jnp.maximum(
        jnp.dot(x2d, w1.astype(cdt), preferred_element_type=jnp.float32) + b1, 0.0)
    x_e = jnp.dot(h1.astype(cdt), w2.astype(cdt),
                  preferred_element_type=jnp.float32) + b2
    h2 = jnp.maximum(
        jnp.dot(x_e.astype(cdt), w3.astype(cdt),
                preferred_element_type=jnp.float32) + b3, 0.0)
    y = jnp.dot(h2.astype(cdt), w4.astype(cdt),
                preferred_element_type=jnp.float32) + b4
    return x_e, y


if __name__ == "__main__":
    input_size, num_features, num_classes = 64, 32, 4
    batch = 16

    key = jax.random.PRNGKey(0)
    pkey, xkey = jax.random.split(key)
    params = init_params(pkey, input_size, num_features, num_classes)
    x = jax.random.normal(xkey, (batch, input_size), jnp.float32)

    prepared = prepare_params(params)                 # one-time weight prep
    fwd = jax.jit(functools.partial(classifier_forward,
                                    num_features=num_features,
                                    num_classes=num_classes,
                                    batch_tile=512))
    x_e, y_logit = fwd(x, prepared)
    jax.block_until_ready((x_e, y_logit))

    xe_ref, logit_ref = reference_forward(x, params)
    assert x_e.shape == (batch, num_features)
    assert y_logit.shape == (batch, num_classes)
    assert jnp.allclose(x_e, xe_ref, atol=2e-3, rtol=2e-3)
    assert jnp.allclose(y_logit, logit_ref, atol=2e-3, rtol=2e-3)

    print("KERNEL_OK")
</pallas_src>

<mosaic_0001>
module attributes {stable_mosaic.version = 11 : i64} {
  func.func @_classifier_kernel(%arg0: i32, %arg1: memref<8x64xf32, #tpu.memory_space<vmem>>, %arg2: memref<64x256xbf16, #tpu.memory_space<vmem>>, %arg3: memref<1x256xf32, #tpu.memory_space<vmem>>, %arg4: memref<256x128xbf16, #tpu.memory_space<vmem>>, %arg5: memref<1x128xf32, #tpu.memory_space<vmem>>, %arg6: memref<128x32xbf16, #tpu.memory_space<vmem>>, %arg7: memref<1x32xf32, #tpu.memory_space<vmem>>, %arg8: memref<32x128xbf16, #tpu.memory_space<vmem>>, %arg9: memref<1x128xf32, #tpu.memory_space<vmem>>, %arg10: memref<8x128xf32, #tpu.memory_space<vmem>>) attributes {dimension_semantics = [#tpu.dimension_semantics<parallel>], iteration_bounds = array<i64: 2>, scalar_prefetch = 0 : i64, scratch_operands = 0 : i64, tpu.core_type = #tpu.core_type<tc>, window_params = [{transform_indices = @transform_0, window_bounds = array<i64: 8, 64>}, {pipeline_mode = #tpu.pipeline_mode<synchronous>, transform_indices = @transform_1, window_bounds = array<i64: 64, 256>}, {pipeline_mode = #tpu.pipeline_mode<synchronous>, transform_indices = @transform_2, window_bounds = array<i64: 1, 256>}, {pipeline_mode = #tpu.pipeline_mode<synchronous>, transform_indices = @transform_3, window_bounds = array<i64: 256, 128>}, {pipeline_mode = #tpu.pipeline_mode<synchronous>, transform_indices = @transform_4, window_bounds = array<i64: 1, 128>}, {pipeline_mode = #tpu.pipeline_mode<synchronous>, transform_indices = @transform_5, window_bounds = array<i64: 128, 32>}, {pipeline_mode = #tpu.pipeline_mode<synchronous>, transform_indices = @transform_6, window_bounds = array<i64: 1, 32>}, {pipeline_mode = #tpu.pipeline_mode<synchronous>, transform_indices = @transform_7, window_bounds = array<i64: 32, 128>}, {pipeline_mode = #tpu.pipeline_mode<synchronous>, transform_indices = @transform_8, window_bounds = array<i64: 1, 128>}, {transform_indices = @transform_9, window_bounds = array<i64: 8, 128>}]} {
    %c0 = arith.constant 0 : index
    %c0_0 = arith.constant 0 : index
    %0 = vector.load %arg1[%c0, %c0_0] : memref<8x64xf32, #tpu.memory_space<vmem>>, vector<8x64xf32>
    %1 = arith.truncf %0 : vector<8x64xf32> to vector<8x64xbf16>
    %c0_1 = arith.constant 0 : index
    %c0_2 = arith.constant 0 : index
    %2 = vector.load %arg2[%c0_1, %c0_2] : memref<64x256xbf16, #tpu.memory_space<vmem>>, vector<64x256xbf16>
    %cst = arith.constant dense<0.000000e+00> : vector<8x256xf32>
    %3 = tpu.matmul %1, %2, %cst {dimension_numbers = #tpu.dot_dimension_numbers<[1], [0], [0], [1], [0, 0, 1, 1], [], []>} : vector<8x64xbf16>, vector<64x256xbf16>, vector<8x256xf32> -> vector<8x256xf32>
    %c0_3 = arith.constant 0 : index
    %c0_4 = arith.constant 0 : index
    %4 = vector.load %arg3[%c0_3, %c0_4] : memref<1x256xf32, #tpu.memory_space<vmem>>, vector<1x256xf32>
    %5 = vector.broadcast %4 : vector<1x256xf32> to vector<8x256xf32>
    %6 = arith.addf %3, %5 : vector<8x256xf32>
    %cst_5 = arith.constant 0.000000e+00 : f32
    %7 = vector.broadcast %cst_5 : f32 to vector<8x256xf32>
    %8 = arith.maximumf %6, %7 : vector<8x256xf32>
    %9 = arith.truncf %8 : vector<8x256xf32> to vector<8x256xbf16>
    %c0_6 = arith.constant 0 : index
    %c0_7 = arith.constant 0 : index
    %10 = vector.load %arg4[%c0_6, %c0_7] : memref<256x128xbf16, #tpu.memory_space<vmem>>, vector<256x128xbf16>
    %cst_8 = arith.constant dense<0.000000e+00> : vector<8x128xf32>
    %11 = tpu.matmul %9, %10, %cst_8 {dimension_numbers = #tpu.dot_dimension_numbers<[1], [0], [0], [1], [0, 0, 1, 1], [], []>} : vector<8x256xbf16>, vector<256x128xbf16>, vector<8x128xf32> -> vector<8x128xf32>
    %c0_9 = arith.constant 0 : index
    %c0_10 = arith.constant 0 : index
    %12 = vector.load %arg5[%c0_9, %c0_10] : memref<1x128xf32, #tpu.memory_space<vmem>>, vector<1x128xf32>
    %13 = vector.broadcast %12 : vector<1x128xf32> to vector<8x128xf32>
    %14 = arith.addf %11, %13 : vector<8x128xf32>
    %15 = arith.truncf %14 : vector<8x128xf32> to vector<8x128xbf16>
    %c0_11 = arith.constant 0 : index
    %c0_12 = arith.constant 0 : index
    %16 = vector.load %arg6[%c0_11, %c0_12] : memref<128x32xbf16, #tpu.memory_space<vmem>>, vector<128x32xbf16>
    %cst_13 = arith.constant dense<0.000000e+00> : vector<8x32xf32>
    %17 = tpu.matmul %15, %16, %cst_13 {dimension_numbers = #tpu.dot_dimension_numbers<[1], [0], [0], [1], [0, 0, 1, 1], [], []>} : vector<8x128xbf16>, vector<128x32xbf16>, vector<8x32xf32> -> vector<8x32xf32>
    %c0_14 = arith.constant 0 : index
    %c0_15 = arith.constant 0 : index
    %18 = vector.load %arg7[%c0_14, %c0_15] : memref<1x32xf32, #tpu.memory_space<vmem>>, vector<1x32xf32>
    %19 = vector.broadcast %18 : vector<1x32xf32> to vector<8x32xf32>
    %20 = arith.addf %17, %19 : vector<8x32xf32>
    %cst_16 = arith.constant 0.000000e+00 : f32
    %21 = vector.broadcast %cst_16 : f32 to vector<8x32xf32>
    %22 = arith.maximumf %20, %21 : vector<8x32xf32>
    %23 = arith.truncf %22 : vector<8x32xf32> to vector<8x32xbf16>
    %c0_17 = arith.constant 0 : index
    %c0_18 = arith.constant 0 : index
    %24 = vector.load %arg8[%c0_17, %c0_18] : memref<32x128xbf16, #tpu.memory_space<vmem>>, vector<32x128xbf16>
    %cst_19 = arith.constant dense<0.000000e+00> : vector<8x128xf32>
    %25 = tpu.matmul %23, %24, %cst_19 {dimension_numbers = #tpu.dot_dimension_numbers<[1], [0], [0], [1], [0, 0, 1, 1], [], []>} : vector<8x32xbf16>, vector<32x128xbf16>, vector<8x128xf32> -> vector<8x128xf32>
    %c0_20 = arith.constant 0 : index
    %c0_21 = arith.constant 0 : index
    %26 = vector.load %arg9[%c0_20, %c0_21] : memref<1x128xf32, #tpu.memory_space<vmem>>, vector<1x128xf32>
    %27 = vector.broadcast %26 : vector<1x128xf32> to vector<8x128xf32>
    %28 = arith.addf %25, %27 : vector<8x128xf32>
    %29 = arith.addf %14, %28 : vector<8x128xf32>
    %c0_22 = arith.constant 0 : index
    %c0_23 = arith.constant 0 : index
    %30 = vector.load %arg10[%c0_22, %c0_23] : memref<8x128xf32, #tpu.memory_space<vmem>>, vector<8x128xf32>
    tpu.vector_store %arg10[%c0_22, %c0_23], %29 {strides = array<i32>} : memref<8x128xf32, #tpu.memory_space<vmem>>, vector<8x128xf32>,
    return
  }
  func.func @transform_0(%arg0: i32) -> (i32, i32) {
    %c0_i32 = arith.constant 0 : i32
    %c0_i32_0 = arith.constant 0 : i32
    return %arg0, %c0_i32 : i32, i32
  }
  func.func @transform_1(%arg0: i32) -> (i32, i32) {
    %c0_i32 = arith.constant 0 : i32
    %c0_i32_0 = arith.constant 0 : i32
    %c0_i32_1 = arith.constant 0 : i32
    return %c0_i32, %c0_i32_0 : i32, i32
  }
  func.func @transform_2(%arg0: i32) -> (i32, i32) {
    %c0_i32 = arith.constant 0 : i32
    %c0_i32_0 = arith.constant 0 : i32
    %c0_i32_1 = arith.constant 0 : i32
    return %c0_i32, %c0_i32_0 : i32, i32
  }
  func.func @transform_3(%arg0: i32) -> (i32, i32) {
    %c0_i32 = arith.constant 0 : i32
    %c0_i32_0 = arith.constant 0 : i32
    %c0_i32_1 = arith.constant 0 : i32
    return %c0_i32, %c0_i32_0 : i32, i32
  }
  func.func @transform_4(%arg0: i32) -> (i32, i32) {
    %c0_i32 = arith.constant 0 : i32
    %c0_i32_0 = arith.constant 0 : i32
    %c0_i32_1 = arith.constant 0 : i32
    return %c0_i32, %c0_i32_0 : i32, i32
  }
  func.func @transform_5(%arg0: i32) -> (i32, i32) {
    %c0_i32 = arith.constant 0 : i32
    %c0_i32_0 = arith.constant 0 : i32
    %c0_i32_1 = arith.constant 0 : i32
    return %c0_i32, %c0_i32_0 : i32, i32
  }
  func.func @transform_6(%arg0: i32) -> (i32, i32) {
    %c0_i32 = arith.constant 0 : i32
    %c0_i32_0 = arith.constant 0 : i32
    %c0_i32_1 = arith.constant 0 : i32
    return %c0_i32, %c0_i32_0 : i32, i32
  }
  func.func @transform_7(%arg0: i32) -> (i32, i32) {
    %c0_i32 = arith.constant 0 : i32
    %c0_i32_0 = arith.constant 0 : i32
    %c0_i32_1 = arith.constant 0 : i32
    return %c0_i32, %c0_i32_0 : i32, i32
  }
  func.func @transform_8(%arg0: i32) -> (i32, i32) {
    %c0_i32 = arith.constant 0 : i32
    %c0_i32_0 = arith.constant 0 : i32
    %c0_i32_1 = arith.constant 0 : i32
    return %c0_i32, %c0_i32_0 : i32, i32
  }
  func.func @transform_9(%arg0: i32) -> (i32, i32) {
    %c0_i32 = arith.constant 0 : i32
    %c0_i32_0 = arith.constant 0 : i32
    return %arg0, %c0_i32 : i32, i32
  }
}

</mosaic_0001>

<bundles_post_ra>
// kernel: classifier_forward.1
= control target key start
LH: loop header
LB: loop body
LE: loop exit
PB: predicated region body
PF: predicated region fallthrough
CT: control target
= control target key end

     0   :  { %14 = vsyncpa [#allocation3], 0  ;;  %s1372_s0 = inlined_call_operand.vmem [shape: f32[16,64], index: 0, kind: input, shape index: {}]   ;;  %s1373_s1 = inlined_call_operand.vmem [shape: bf16[64,256], index: 1, kind: input, shape index: {}]   ;;  %s1374_s2 = inlined_call_operand.hbm [shape: f32[1,256], index: 2, kind: input, shape index: {}]   ;;  %s1375_s3 = inlined_call_operand.hbm [shape: bf16[256,128], index: 3, kind: input, shape index: {}]   ;;  %s1376_s4 = inlined_call_operand.vmem [shape: f32[1,128], index: 4, kind: input, shape index: {}]   ;;  %s1377_s5 = inlined_call_operand.vmem [shape: bf16[128,32], index: 5, kind: input, shape index: {}]   ;;  %s1378_s6 = inlined_call_operand.vmem [shape: f32[1,32], index: 6, kind: input, shape index: {}]   ;;  %s1379_s7 = inlined_call_operand.hbm [shape: bf16[32,128], index: 7, kind: input, shape index: {}]   ;;  %s1380_s8 = inlined_call_operand.vmem [shape: f32[1,128], index: 8, kind: input, shape index: {}]   ;;  %s1381_s9 = inlined_call_operand.vmem [shape: f32[16,128], index: 9, kind: output, shape index: {}]  }
   0x1   :  { %15 = vsyncpa [#allocation5], 0  ;;  %s1225_s30 = smov 0  }
   0x2 LB: > { %s272_s12 = sshll.u32 %s1375_s3, 4  ;;  %s1234_s13 = sadd.s32 4294967295, %s1168_s30   ;;  %s1168_s30 = sphi %s1225_s30, %s21_s30   ;;  %s273_s12 = int_to_ptr.hbm [resolvable:$true] %s272_s12 }
   0x3   : > { %p834_p0 = scmp.ge.s32.totalorder %s1168_s30, 1  ;;  %p246_p1 = scmp.lt.s32.totalorder %s1168_s30, 3 }
   0x4   : > { %p1042_p2 = scmp.eq.s32.totalorder %s1234_s13, 0  ;;  %s1170_s15 = smov [#allocation4]  }
   0x5   : > { %p1239_p3 = pnand %p834_p0, %p246_p1  ;;  %s274_s16 = sshll.u32 %s1170_s15, 4  ;;  %s275_s16 = int_to_ptr.vmem [resolvable:$true] %s274_s16 }
   0x6   : > { %s261_s19 = sshll.u32 %s1374_s2, 4  ;;  %s1171_s21 = smov [#allocation2]   ;;  %s262_s19 = int_to_ptr.hbm [resolvable:$true] %s261_s19 }
   0x7   : > { %p1032_p4 = pneg %p1239_p3  ;;  %s263_s22 = sshll.u32 %s1171_s21, 4  ;;  %s264_s22 = int_to_ptr.vmem [resolvable:$true] %s263_s22 }
   0x8   : > { %s295_s25 = sshll.u32 %s1379_s7, 4  ;;  %s1172_s26 = smov 64   ;;  %s296_s25 = int_to_ptr.hbm [resolvable:$true] %s295_s25 }
   0x9   : > { %p1250_p5 = pnand %p1042_p2, %p1032_p4  ;;  %s1173_s27 = smov 4  }
   0xa   : > { %s1174_s28 = smov [#allocation6]   ;;  %323 = sbr.rel (%p1239_p3) target bundleno = 573 (0x23d), region = 56 }
   0xb   : > { %1038 = dma.hbm_to_vmem [thread:$0]  (!%p1250_p5), %s273_s12, 2048, %s275_s16, [#allocation5], %s1172_s26, %s1172_s26, %s1173_s27  }
   0xc   : > { %1035 = dma.hbm_to_vmem [thread:$0]  (!%p1250_p5), %s262_s19, 32, %s264_s22, [#allocation3]  }
   0xd   : > { %s297_s29 = sshll.u32 %s1174_s28, 4  ;;  %s298_s29 = int_to_ptr.vmem [resolvable:$true] %s297_s29 }
   0xe   : > { %1041 = dma.hbm_to_vmem [thread:$0]  (!%p1250_p5), %s296_s25, 256, %s298_s29, [#allocation5], %s1172_s26, %s1172_s26, %s1173_s27  }
   0xf   : > { %1159 = dma.done.wait (%p1042_p2), [#allocation3], 32  }
  0x10   : > { %1161 = vsyncadd (%p1042_p2), [#allocation3], 4294967264 }
  0x11   : > { %1163 = dma.done.wait (%p1042_p2), [#allocation5], 2304  }
  0x12   : > { %1165 = vsyncadd (%p1042_p2), [#allocation5], 4294964992  ;;  %p368_p6 = scmp.lt.s32.totalorder %s1234_s13, 1  ;;  %v871_v0 = vld [vmem:[%s1373_s1 + $0x30] sm:$0xf]  ;;  %v1001_v16 = vld [vmem:[#allocation4 + $0x38] sm:$0xff] }
  0x13   : > { %v993_v1 = vld [vmem:[%s1373_s1 + $0x34] sm:$0xf0]  ;;  %v992_v2 = vld [vmem:[%s1373_s1 + $0x34] sm:$0xf]  ;;  %v873_v4 = vld [vmem:[%s1373_s1 + $0x38] sm:$0xf0]  ;;  %599 = vmatpush.bf16.msra.mxu2 %v1001_v16 }
  0x14   : > { %s1385_s13 = smov (!%p368_p6, %s1234_s13), 1  ;;  %v872_v3 = vor.u32 %v993_v1, %v871_v0  ;;  %v863_v5 = vld [vmem:[%s1373_s1 + $0x20] sm:$0xf]  ;;  %v991_v6 = vld [vmem:[%s1373_s1 + $0x24] sm:$0xf0]  ;;  %v876_v7 = vor.u32 %v992_v2, %v873_v4  ;;  %v1000_v19 = vld [vmem:[#allocation4 + $0x30] sm:$0xff] }
  0x15   : > { %v990_v8 = vld [vmem:[%s1373_s1 + $0x24] sm:$0xf]  ;;  %v865_v9 = vld [vmem:[%s1373_s1 + $0x28] sm:$0xf0]  ;;  %v864_v10 = vor.u32 %v991_v6, %v863_v5  ;;  %v855_v12 = vld [vmem:[%s1373_s1 + $0x10] sm:$0xf] }
  0x16   : > { %441 = vmatpush.bf16.msra.mxu0 %v872_v3  ;;  %454 = vmatpush.bf16.msra.mxu1 %v876_v7  ;;  %v868_v11 = vor.u32 %v990_v8, %v865_v9  ;;  %v989_v13 = vld [vmem:[%s1373_s1 + $0x14] sm:$0xf0]  ;;  %v988_v14 = vld [vmem:[%s1373_s1 + $0x14] sm:$0xf]  ;;  %v857_v15 = vld [vmem:[%s1373_s1 + $0x18] sm:$0xf0] }
  0x17   : > { %s843_s16 = sshll.u32 %s1385_s13, 3  ;;  %v1009_v17 = vld [vmem:[#allocation4 + $0x78] sm:$0xff]  ;;  %v856_v18 = vor.u32 %v989_v13, %v855_v12  ;;  %v860_v20 = vor.u32 %v988_v14, %v857_v15  ;;  %v987_v22 = vld [vmem:[%s1373_s1 + $0x4] sm:$0xf0]  ;;  %v1008_v23 = vld [vmem:[#allocation4 + $0x70] sm:$0xff]  ;;  %600 = vmatpush.bf16.msra.mxu2 %v1000_v19  ;;  %vm433_vm0 = vcmask 523264  }
  0x18   : > { %v847_v21 = vld [vmem:[%s1373_s1] sm:$0xf]  ;;  %s371_s23 = scalar_lea.vmem %s1372_s0, %s843_s16  ;;  %612 = vmatpush.bf16.msra.mxu3 %v1009_v17  ;;  %v986_v24 = vld [vmem:[%s1373_s1 + $0x4] sm:$0xf]  ;;  %v849_v25 = vld [vmem:[%s1373_s1 + $0x8] sm:$0xf0]  ;;  %s375_s15 = scalar_lea.vmem %s1381_s9, %s843_s16 }
  0x19   : > { %v848_v26 = vor.u32 %v987_v22, %v847_v21  ;;  %v377_v27 = vld [vmem:[%s371_s23] sm:$0xff]  ;;  %v999_v28 = vld [vmem:[#allocation4 + $0x28] sm:$0xff]  ;;  %v852_v29 = vor.u32 %v986_v24, %v849_v25  ;;  %v996_v36 = vld [vmem:[#allocation4 + $0x10] sm:$0xff]  ;;  %vm729_vm1 = vcmask 261120  }
  0x1a   : > { %442 = vmatpush.bf16.msra.mxu0 %v864_v10  ;;  %455 = vmatpush.bf16.msra.mxu1 %v868_v11  ;;  %v1007_v30 = vld [vmem:[#allocation4 + $0x68] sm:$0xff]  ;;  %v378_v31 = vpack.c.bf16 %v377_v27, %v377_v27  ;;  %v998_v32 = vld [vmem:[#allocation4 + $0x20] sm:$0xff]  ;;  %v997_v34 = vld [vmem:[#allocation4 + $0x18] sm:$0xff] }
  0x1b   : > { %601 = vmatpush.bf16.msra.mxu2 %v999_v28  ;;  %v1006_v33 = vld [vmem:[#allocation4 + $0x60] sm:$0xff]  ;;  %v1005_v35 = vld [vmem:[#allocation4 + $0x58] sm:$0xff]  ;;  %v1004_v37 = vld [vmem:[#allocation4 + $0x50] sm:$0xff] }
  0x1c   : > { %613 = vmatpush.bf16.msra.mxu3 %v1008_v23  ;;  %v995_v38 = vld [vmem:[#allocation4 + $0x8] sm:$0xff]  ;;  %v994_v40 = vld [vmem:[#allocation4] sm:$0xff]  ;;  %v1017_v42 = vld [vmem:[%s1377_s5 + $0x38] sm:$0xff] }
  0x1d   : > { %v1003_v39 = vld [vmem:[#allocation4 + $0x48] sm:$0xff]  ;;  %v1002_v41 = vld [vmem:[#allocation4 + $0x40] sm:$0xff]  ;;  %v1013_v46 = vld [vmem:[%s1377_s5 + $0x18] sm:$0xff] }
  0x1e   : > { %443 = vmatpush.bf16.msra.mxu0 %v856_v18  ;;  %456 = vmatpush.bf16.msra.mxu1 %v860_v20  ;;  %v1016_v43 = vld [vmem:[%s1377_s5 + $0x30] sm:$0xff]  ;;  %v1015_v44 = vld [vmem:[%s1377_s5 + $0x28] sm:$0xff]  ;;  %v1014_v45 = vld [vmem:[%s1377_s5 + $0x20] sm:$0xff] }
  0x1f   : > { %602 = vmatpush.bf16.msra.mxu2 %v998_v32  ;;  %v387_v47 = vld [vmem:[#allocation2] sm:$0x3]  ;;  %v1012_v48 = vld [vmem:[%s1377_s5 + $0x10] sm:$0xff]  ;;  %v1011_v61 = vld [vmem:[%s1377_s5 + $0x8] sm:$0xff] }
  0x20   : > { %614 = vmatpush.bf16.msra.mxu3 %v1007_v30  ;;  %v389_v49 = vperm.slane %v387_v47, 0  ;;  %v390_v50 = vperm.slane %v387_v47, 1  ;;  %v1010_v62 = vld [vmem:[%s1377_s5] sm:$0xff]  ;;  %v1019_v63 = vld [vmem:[#allocation6 + $0x8] sm:$0xff] }
  0x21   : > { %v1018_v0 = vld [vmem:[#allocation6] sm:$0xff]  ;;  %v1061_v1 = vld [vmem:[%s1376_s4] ss:$0 sm:$0xff] }
  0x22   : > { %444 = vmatpush.bf16.msra.mxu0 %v848_v26  ;;  %457 = vmatpush.bf16.msra.mxu1 %v852_v29  ;;  %v1062_v9 = vld [vmem:[%s1378_s6] ss:$0 sm:$0xff] }
  0x23   : > { %603 = vmatpush.bf16.msra.mxu2 %v997_v34  ;;  %v1063_v15 = vld [vmem:[%s1380_s8] ss:$0 sm:$0xff] }
  0x24   : > { %615 = vmatpush.bf16.msra.mxu3 %v1006_v33 }
  0x25   : > { %877 = vmatmul.msk.bf16.vlgmr.msra.gmra.mxu0 %vm433_vm0, %v378_v31  ;;  %878 = vmatmul.msk.bf16.vlgmr.msra.gmra.mxu1 %vm433_vm0, %v378_v31 }
  0x26   : > { %694 = vmatpush.bf16.msrb.mxu0 %v1017_v42  ;;  %739 = vmatpush.bf16.msrb.mxu1 %v1019_v63 }
  0x27   : > { %604 = vmatpush.bf16.msra.mxu2 %v996_v36 }
  0x28   : > { %616 = vmatpush.bf16.msra.mxu3 %v1005_v35 }
  0x2a   : > { %695 = vmatpush.bf16.msrb.mxu0 %v1016_v43  ;;  %740 = vmatpush.bf16.msrb.mxu1 %v1018_v0 }
  0x2b   : > { %605 = vmatpush.bf16.msra.mxu2 %v995_v38 }
  0x2c   : > { %617 = vmatpush.bf16.msra.mxu3 %v1004_v37 }
  0x2e   : > { %696 = vmatpush.bf16.msrb.mxu0 %v1015_v44 }
  0x2f   : > { %606 = vmatpush.bf16.msra.mxu2 %v994_v40 }
  0x30   : > { %618 = vmatpush.bf16.msra.mxu3 %v1003_v39 }
  0x32   : > { %697 = vmatpush.bf16.msrb.mxu0 %v1014_v45 }
  0x34   : > { %619 = vmatpush.bf16.msra.mxu3 %v1002_v41 }
  0x36   : > { %698 = vmatpush.bf16.msrb.mxu0 %v1013_v46 }
  0x3a   : > { %699 = vmatpush.bf16.msrb.mxu0 %v1012_v48 }
  0x3e   : > { %700 = vmatpush.bf16.msrb.mxu0 %v1011_v61 }
  0x42   : > { %701 = vmatpush.bf16.msrb.mxu0 %v1010_v62 }
  0xa2   : > { %v446_v51 = vpop.f32.mrf.mxu0  ;;  %v459_v53 = vpop.f32.mrf.mxu1 }
  0xa3   : > { %v447_v52 = vadd.f32 %v446_v51, %v389_v49  ;;  %v460_v54 = vadd.f32 %v459_v53, %v390_v50 }
  0xa5   : > { %v463_v55 = vmax.f32 %v447_v52, 0.0  ;;  %v464_v56 = vmax.f32 %v460_v54, 0.0 }
  0xa7   : > { %v465_v57 = vpack.c.bf16 %v463_v55, %v463_v55  ;;  %v466_v58 = vpack.c.bf16 %v464_v56, %v464_v56 }
  0xa9   : > { %607 = vmatmul.bf16.vlgmr.msra.gmra.mxu2 %v465_v57  ;;  %620 = vmatmul.bf16.vlgmr.msra.gmra.mxu3 %v466_v58 }
  0xaa   : > { %v448_v59 = vpop.f32.mrf.mxu0  ;;  %v461_v60 = vpop.f32.mrf.mxu1 }
 0x12c   : > { %v608_v2 = vpop.f32.mrf.mxu2  ;;  %v621_v4 = vpop.f32.mrf.mxu3 }
 0x12d   : > { %v609_v3 = vadd.f32 %v1061_v1, %v608_v2 }
 0x12f   : > { %v622_v5 = vadd.f32 %v621_v4, %v609_v3 }
 0x131   : > { %v625_v6 = vpack.c.bf16 %v622_v5, %v622_v5 }
 0x133   : > { %702 = vmatmul.bf16.vlgmr.msrb.gmra.mxu0 %v625_v6 }
 0x134   : > { %v610_v7 = vpop.f32.mrf.mxu2  ;;  %v623_v8 = vpop.f32.mrf.mxu3 }
 0x1b0   : > { %v703_v10 = vpop.f32.mrf.mxu0 }
 0x1b1   : > { %v704_v11 = vadd.f32 %v1062_v9, %v703_v10 }
 0x1b3   : > { %v707_v12 = vmax.f32 %v704_v11, 0.0 }
 0x1b5   : > { %v708_v13 = vpack.c.bf16 %v707_v12, %v707_v12 }
 0x1b7   : > { %983 = vmatmul.msk.bf16.vlgmr.msrb.gmra.mxu1 %vm729_vm1, %v708_v13 }
 0x1b8   : > { %v705_v14 = vpop.f32.mrf.mxu0 }
 0x234   : > { %v742_v16 = vpop.f32.mrf.mxu1 }
 0x235   : > { %v743_v17 = vadd.f32 %v1063_v15, %v742_v16 }
 0x237   : > { %v746_v18 = vadd.f32 %v743_v17, %v622_v5 }
 0x239   : > { %747 = vst [vmem:[%s375_s15] sm:$0xff] %v746_v18 }
 0x23c   : > { %v744_v19 = vpop.f32.mrf.mxu1 }
 0x23d PF: > { %s21_s30 = sadd.s32 1, %s1168_s30  }
 0x23e   : > { %p18_p7 = scmp.ge.s32.totalorder %s21_s30, 4  }
 0x240   :  { %20 = sbr.rel (!%p18_p7) target bundleno = 2 (0x2), region = 99 }
 0x245   :  { %767 = vsyncpa [#allocation3], 1 }
 0x246   :  { %769 = vsyncpa [#allocation3 + $0x1], 1 }
 0x247   :  { %770 = vsyncpa [#allocation5], 1 }

</bundles_post_ra>
